<compile_context>
chip_gen: v6e
topology: v6e:2x2x1
jax: 0.10.0
libtpu: 0.0.40
codegen_flags: <defaults>
</compile_context>

<pallas_src>
import math

import jax
import jax.numpy as jnp
from jax.experimental import pallas as pl
from jax.experimental.pallas import tpu as pltpu

LN_EPS = 1e-5   # nn.LayerNorm default
KSIZE = 7
PAD = 3         # conv "same" padding for kernel_size=7
LPAD = 8        # sublane-aligned left halo in the VMEM-resident activation slab
RPAD = 8

VMEM_LIMIT = 48 * 1024 * 1024


# ----------------------------- in-kernel helpers -----------------------------
def _layernorm(x, g, b):
    mean = jnp.mean(x, axis=-1, keepdims=True)
    xc = x - mean
    var = jnp.mean(xc * xc, axis=-1, keepdims=True)
    return xc * jax.lax.rsqrt(var + LN_EPS) * g + b


def _gelu_tanh(x):
    # tanh-form GELU: the tanh runs on the EUP slot and co-issues with VPU/MXU.
    # TODO(synk): F.gelu defaults to exact erf; tanh form differs by ~1e-3 abs.
    c = math.sqrt(2.0 / math.pi)
    return 0.5 * x * (1.0 + jnp.tanh(c * (x + 0.044715 * x * x * x)))


# ------------------- Kernel 1: in_conv (k=7) + LayerNorm (im2col) -------------------
def in_conv_norm_kernel(x_ref, w_ref, b_ref, g_ref, beta_ref, o_ref):
    T = o_ref.shape[1]
    x = x_ref[0].astype(jnp.bfloat16)                       # (T, Cin), unpadded
    zpad = jnp.zeros((PAD, x.shape[1]), jnp.bfloat16)
    xp = jnp.concatenate([zpad, x, zpad], axis=0)           # (T+6, Cin), halo in VMEM
    # im2col: one MXU dot with contraction depth 7*Cin instead of 7 shallow dots.
    cols = jnp.concatenate([xp[k:k + T, :] for k in range(KSIZE)], axis=1)  # (T, 7*Cin)
    acc = jnp.dot(cols, w_ref[...], preferred_element_type=jnp.float32) + b_ref[0]
    o_ref[0] = _layernorm(acc, g_ref[0], beta_ref[0]).astype(o_ref.dtype)


# ---- Kernel 2: fused ConvNeXt stack (dwconv + LN + MLP + GRN, all layers) ----
def convnext_stack_kernel(x_ref, dww_ref, dwb_ref, g_ref, beta_ref,
                          w1_ref, b1_ref, gg_ref, gb_ref, w2_ref, b2_ref,
                          o_ref, xs_ref):
    # grid = (B, L).  The activation stays in VMEM scratch `xs_ref` for the whole
    # layer stack of one batch element; only the per-layer weights are streamed.
    l = pl.program_id(1)
    T = o_ref.shape[1]
    C = o_ref.shape[2]

    @pl.when(l == 0)
    def _load():
        xs_ref[...] = jnp.zeros_like(xs_ref)                # zero halo rows once
        xs_ref[LPAD:LPAD + T, :] = x_ref[0]

    xp = xs_ref[...]                                        # (LPAD+T+RPAD, C) f32
    res = xp[LPAD:LPAD + T, :]

    # depthwise conv, kernel_size=7, padding=3 (halo rows are zero)
    dww = dww_ref[0]                                        # (7, C)
    acc = jnp.zeros((T, C), jnp.float32)
    for k in range(KSIZE):
        s = LPAD - PAD + k
        acc += xp[s:s + T, :] * dww[k]
    acc = acc + dwb_ref[0]

    xn = _layernorm(acc, g_ref[0], beta_ref[0])
    h = jnp.dot(xn.astype(jnp.bfloat16), w1_ref[0],
                preferred_element_type=jnp.float32) + b1_ref[0]
    h = _gelu_tanh(h)

    # GRN: L2 norm over time (dim=1 in torch's (B,T,H)), normalized by channel mean.
    # NOTE: spec has no epsilon in the denominator; matched exactly.
    gx = jnp.sqrt(jnp.sum(h * h, axis=0, keepdims=True))    # (1, H)
    nx = gx / jnp.mean(gx, axis=-1, keepdims=True)
    h = gg_ref[0] * (nx * h) + gb_ref[0] + h

    y = jnp.dot(h.astype(jnp.bfloat16), w2_ref[0],
                preferred_element_type=jnp.float32) + b2_ref[0]
    out = res + y
    xs_ref[LPAD:LPAD + T, :] = out                          # feed next layer (VMEM)

    @pl.when(l == pl.num_programs(1) - 1)
    def _store():
        o_ref[0] = out.astype(o_ref.dtype)


# --- Kernel 3: last LayerNorm + mag/phase 1x1 convs + exp/clamp + cos/sin + iDFT ---
def head_kernel(x_ref, g_ref, beta_ref, wm_ref, bm_ref, wp_ref, bp_ref,
                br_ref, bi_ref, o_ref):
    x = x_ref[0]                                            # (T, C)
    xn = _layernorm(x, g_ref[0], beta_ref[0]).astype(jnp.bfloat16)
    mag = jnp.dot(xn, wm_ref[...], preferred_element_type=jnp.float32) + bm_ref[0]
    phase = jnp.dot(xn, wp_ref[...], preferred_element_type=jnp.float32) + bp_ref[0]
    mag = jnp.minimum(jnp.exp(mag), 100.0)                  # .exp().clamp_max(100.)
    re = (mag * jnp.cos(phase)).astype(jnp.bfloat16)
    im = (mag * jnp.sin(phase)).astype(jnp.bfloat16)
    # windowed real iDFT of each frame, expressed as two matmuls
    frames = (jnp.dot(re, br_ref[...], preferred_element_type=jnp.float32)
              + jnp.dot(im, bi_ref[...], preferred_element_type=jnp.float32))
    o_ref[0] = frames.astype(o_ref.dtype)                   # (T, n_fft)


# ------------------------------- pallas_call glue -------------------------------
def _rep1(shape):
    n = len(shape)
    return pl.BlockSpec(shape, lambda i, _n=n: (0,) * _n)


def run_in_conv(x, w_flat, b, g, beta):
    B, T, Cin = x.shape
    C = w_flat.shape[1]
    return pl.pallas_call(
        in_conv_norm_kernel,
        out_shape=jax.ShapeDtypeStruct((B, T, C), jnp.float32),
        grid=(B,),
        in_specs=[pl.BlockSpec((1, T, Cin), lambda i: (i, 0, 0)),
                  _rep1(w_flat.shape), _rep1(b.shape),
                  _rep1(g.shape), _rep1(beta.shape)],
        out_specs=pl.BlockSpec((1, T, C), lambda i: (i, 0, 0)),
        compiler_params=pltpu.CompilerParams(
            dimension_semantics=("parallel",),
            vmem_limit_bytes=VMEM_LIMIT),
    )(x, w_flat, b, g, beta)


def run_convnext_stack(x, sp):
    B, T, C = x.shape
    L = sp["dw_w"].shape[0]

    def wspec(arr):
        shp = arr.shape
        nrest = len(shp) - 1
        return pl.BlockSpec((1,) + shp[1:],
                            lambda b, l, _n=nrest: (l,) + (0,) * _n)

    return pl.pallas_call(
        convnext_stack_kernel,
        out_shape=jax.ShapeDtypeStruct((B, T, C), jnp.float32),
        grid=(B, L),
        in_specs=[pl.BlockSpec((1, T, C), lambda b, l: (b, 0, 0)),
                  wspec(sp["dw_w"]), wspec(sp["dw_b"]),
                  wspec(sp["ln_g"]), wspec(sp["ln_b"]),
                  wspec(sp["w1"]), wspec(sp["b1"]),
                  wspec(sp["grn_g"]), wspec(sp["grn_b"]),
                  wspec(sp["w2"]), wspec(sp["b2"])],
        out_specs=pl.BlockSpec((1, T, C), lambda b, l: (b, 0, 0)),
        scratch_shapes=[pltpu.VMEM((LPAD + T + RPAD, C), jnp.float32)],
        compiler_params=pltpu.CompilerParams(
            dimension_semantics=("parallel", "arbitrary"),
            vmem_limit_bytes=VMEM_LIMIT),
    )(x, sp["dw_w"], sp["dw_b"], sp["ln_g"], sp["ln_b"],
      sp["w1"], sp["b1"], sp["grn_g"], sp["grn_b"], sp["w2"], sp["b2"])


def run_head(x, g, b, wm, bm, wp, bp, br, bi):
    B, T, C = x.shape
    n_fft = br.shape[1]
    return pl.pallas_call(
        head_kernel,
        out_shape=jax.ShapeDtypeStruct((B, T, n_fft), jnp.float32),
        grid=(B,),
        in_specs=[pl.BlockSpec((1, T, C), lambda i: (i, 0, 0)),
                  _rep1(g.shape), _rep1(b.shape),
                  _rep1(wm.shape), _rep1(bm.shape),
                  _rep1(wp.shape), _rep1(bp.shape),
                  _rep1(br.shape), _rep1(bi.shape)],
        out_specs=pl.BlockSpec((1, T, n_fft), lambda i: (i, 0, 0)),
        compiler_params=pltpu.CompilerParams(
            dimension_semantics=("parallel",),
            vmem_limit_bytes=VMEM_LIMIT),
    )(x, g, b, wm, bm, wp, bp, br, bi)


# ---------------------------------- parameters ----------------------------------
def make_istft_basis(n_fft):
    # one-sided inverse rDFT folded with the periodic Hann window
    F = n_fft // 2 + 1
    n = jnp.arange(n_fft, dtype=jnp.float32)
    k = jnp.arange(F, dtype=jnp.float32)
    ang = 2.0 * math.pi * k[:, None] * n[None, :] / n_fft            # (F, N)
    scale = jnp.where((k == 0) | (k == n_fft // 2), 1.0, 2.0)[:, None] / n_fft
    win = 0.5 - 0.5 * jnp.cos(2.0 * math.pi * n / n_fft)             # torch.hann_window
    br = scale * jnp.cos(ang) * win[None, :]
    bi = -scale * jnp.sin(ang) * win[None, :]
    return br.astype(jnp.float32), bi.astype(jnp.float32), win.astype(jnp.float32)


def init_params(key, in_ch, C, H, out_ch, num_layers, n_fft):
    def nrm(k, shape, scale):
        return jax.random.normal(k, shape, jnp.float32) * scale

    keys = jax.random.split(key, 4 + 6 * num_layers)
    ki = iter(keys)
    p = {
        "in_w": nrm(next(ki), (KSIZE, in_ch, C), 1.0 / math.sqrt(in_ch * KSIZE)),
        "in_b": nrm(next(ki), (1, C), 0.02),
        "norm_g": jnp.ones((1, C), jnp.float32),
        "norm_b": jnp.zeros((1, C), jnp.float32),
        "last_g": jnp.ones((1, C), jnp.float32),
        "last_b": jnp.zeros((1, C), jnp.float32),
    }
    layers = []
    for _ in range(num_layers):
        layers.append({
            "dw_w": nrm(next(ki), (KSIZE, C), 1.0 / math.sqrt(KSIZE)),
            "dw_b": nrm(next(ki), (1, C), 0.02),
            "ln_g": jnp.ones((1, C), jnp.float32),
            "ln_b": jnp.zeros((1, C), jnp.float32),
            "w1": nrm(next(ki), (C, H), 1.0 / math.sqrt(C)),
            "b1": nrm(next(ki), (1, H), 0.02),
            "grn_g": jnp.ones((1, H), jnp.float32),    # GRN gamma init = ones
            "grn_b": jnp.zeros((1, H), jnp.float32),   # GRN bias  init = zeros
            "w2": nrm(next(ki), (H, C), 1.0 / math.sqrt(H)),
            "b2": nrm(next(ki), (1, C), 0.02),
        })
    p["layers"] = layers
    p["out_w"] = nrm(next(ki), (C, out_ch), 1.0 / math.sqrt(C))
    p["out_b"] = nrm(next(ki), (1, out_ch), 0.02)
    p["basis_r"], p["basis_i"], p["win"] = make_istft_basis(n_fft)
    return p


def prepare_params(p):
    """Build kernel-ready params: stacked layer weights, bf16 matmul weights,
    reshaped im2col conv weight, lane-aligned mag/phase split."""
    kp = {}
    KS, Cin, C = p["in_w"].shape
    kp["in_w"] = p["in_w"].reshape(KS * Cin, C).astype(jnp.bfloat16)
    kp["in_b"] = p["in_b"]
    kp["norm_g"], kp["norm_b"] = p["norm_g"], p["norm_b"]
    kp["last_g"], kp["last_b"] = p["last_g"], p["last_b"]

    L = len(p["layers"])
    if L > 0:
        def stack(name):
            return jnp.stack([lp[name] for lp in p["layers"]], axis=0)
        kp["stack"] = {
            "dw_w": stack("dw_w"), "dw_b": stack("dw_b"),
            "ln_g": stack("ln_g"), "ln_b": stack("ln_b"),
            "w1": stack("w1").astype(jnp.bfloat16), "b1": stack("b1"),
            "grn_g": stack("grn_g"), "grn_b": stack("grn_b"),
            "w2": stack("w2").astype(jnp.bfloat16), "b2": stack("b2"),
        }
    else:
        kp["stack"] = None

    F = p["out_w"].shape[1] // 2
    kp["w_mag"] = p["out_w"][:, :F].astype(jnp.bfloat16)
    kp["w_phase"] = p["out_w"][:, F:].astype(jnp.bfloat16)
    kp["b_mag"] = p["out_b"][:, :F]
    kp["b_phase"] = p["out_b"][:, F:]
    kp["basis_r"] = p["basis_r"].astype(jnp.bfloat16)
    kp["basis_i"] = p["basis_i"].astype(jnp.bfloat16)
    kp["win"] = p["win"]
    return kp


# ----------------------------------- forward -----------------------------------
def vocos_forward(x, kp, n_fft, hop):
    # x: (B, in_channel, T) — PyTorch NCL convention
    x = jnp.pad(x, ((0, 0), (0, 0), (1, 0)), mode="reflect")   # ReflectionPad1d([1, 0])
    h = jnp.transpose(x, (0, 2, 1)).astype(jnp.float32)        # -> (B, T1, Cin)

    h = run_in_conv(h, kp["in_w"], kp["in_b"], kp["norm_g"], kp["norm_b"])
    if kp["stack"] is not None:
        h = run_convnext_stack(h, kp["stack"])
    frames = run_head(h, kp["last_g"], kp["last_b"],
                      kp["w_mag"], kp["b_mag"], kp["w_phase"], kp["b_phase"],
                      kp["basis_r"], kp["basis_i"])            # (B, T1, n_fft)

    # ISTFT overlap-add + window-envelope normalization + center trim.
    # Single vectorized scatter-add; env is input-independent (constant under jit).
    win = kp["win"]
    B, T1, N = frames.shape
    out_len = N + hop * (T1 - 1)
    pos = (jnp.arange(T1) * hop)[:, None] + jnp.arange(N)[None, :]   # (T1, N)
    flat = pos.reshape(-1)
    sig = jnp.zeros((B, out_len), jnp.float32).at[:, flat].add(
        frames.reshape(B, T1 * N))
    env = jnp.zeros((out_len,), jnp.float32).at[flat].add(
        jnp.broadcast_to(win * win, (T1, N)).reshape(-1))
    s, e = N // 2, out_len - N // 2                            # center=True trimming
    o = sig[:, s:e] / jnp.maximum(env[s:e], 1e-11)[None, :]
    return o[:, None, :]                                       # (B, 1, hop*(T1-1))


if __name__ == "__main__":
    B, in_ch, T = 2, 8, 8
    C, H, num_layers = 32, 64, 2
    n_fft, hop = 16, 4
    out_ch = n_fft + 2        # mag (n_fft//2+1) + phase (n_fft//2+1)

    key = jax.random.PRNGKey(0)
    params = init_params(key, in_ch, C, H, out_ch, num_layers, n_fft)
    kparams = prepare_params(params)
    x = jax.random.normal(jax.random.fold_in(key, 123), (B, in_ch, T), jnp.float32)

    o = vocos_forward(x, kparams, n_fft, hop)
    o = jax.block_until_ready(o)
    assert o.shape == (B, 1, hop * T), o.shape
    assert bool(jnp.all(jnp.isfinite(o)))
    print("KERNEL_OK")
</pallas_src>

<mosaic_0001>
module attributes {stable_mosaic.version = 11 : i64} {
  func.func @in_conv_norm_kernel(%arg0: i32, %arg1: memref<1x9x8xf32, #tpu.memory_space<vmem>>, %arg2: memref<56x32xbf16, #tpu.memory_space<vmem>>, %arg3: memref<1x32xf32, #tpu.memory_space<vmem>>, %arg4: memref<1x32xf32, #tpu.memory_space<vmem>>, %arg5: memref<1x32xf32, #tpu.memory_space<vmem>>, %arg6: memref<1x9x32xf32, #tpu.memory_space<vmem>>) attributes {dimension_semantics = [#tpu.dimension_semantics<parallel>], iteration_bounds = array<i64: 2>, scalar_prefetch = 0 : i64, scratch_operands = 0 : i64, tpu.core_type = #tpu.core_type<tc>, window_params = [{transform_indices = @transform_0, window_bounds = array<i64: 1, 9, 8>}, {pipeline_mode = #tpu.pipeline_mode<synchronous>, transform_indices = @transform_1, window_bounds = array<i64: 56, 32>}, {pipeline_mode = #tpu.pipeline_mode<synchronous>, transform_indices = @transform_2, window_bounds = array<i64: 1, 32>}, {pipeline_mode = #tpu.pipeline_mode<synchronous>, transform_indices = @transform_3, window_bounds = array<i64: 1, 32>}, {pipeline_mode = #tpu.pipeline_mode<synchronous>, transform_indices = @transform_4, window_bounds = array<i64: 1, 32>}, {transform_indices = @transform_5, window_bounds = array<i64: 1, 9, 32>}]} {
    %c0 = arith.constant 0 : index
    %c0_0 = arith.constant 0 : index
    %c0_1 = arith.constant 0 : index
    %0 = vector.load %arg1[%c0, %c0_0, %c0_1] : memref<1x9x8xf32, #tpu.memory_space<vmem>>, vector<1x9x8xf32>
    %1 = vector.shape_cast %0 : vector<1x9x8xf32> to vector<9x8xf32>
    %2 = arith.truncf %1 : vector<9x8xf32> to vector<9x8xbf16>
    %cst = arith.constant 0.000000e+00 : bf16
    %3 = vector.broadcast %cst : bf16 to vector<3x8xbf16>
    %4 = tpu.concatenate %3, %2, %3 in 0 : vector<3x8xbf16>, vector<9x8xbf16>, vector<3x8xbf16> -> vector<15x8xbf16>
    %5 = vector.extract_strided_slice %4 {offsets = [0, 0], sizes = [9, 8], strides = [1, 1]} : vector<15x8xbf16> to vector<9x8xbf16>
    %6 = vector.extract_strided_slice %4 {offsets = [1, 0], sizes = [9, 8], strides = [1, 1]} : vector<15x8xbf16> to vector<9x8xbf16>
    %7 = vector.extract_strided_slice %4 {offsets = [2, 0], sizes = [9, 8], strides = [1, 1]} : vector<15x8xbf16> to vector<9x8xbf16>
    %8 = vector.extract_strided_slice %4 {offsets = [3, 0], sizes = [9, 8], strides = [1, 1]} : vector<15x8xbf16> to vector<9x8xbf16>
    %9 = vector.extract_strided_slice %4 {offsets = [4, 0], sizes = [9, 8], strides = [1, 1]} : vector<15x8xbf16> to vector<9x8xbf16>
    %10 = vector.extract_strided_slice %4 {offsets = [5, 0], sizes = [9, 8], strides = [1, 1]} : vector<15x8xbf16> to vector<9x8xbf16>
    %11 = vector.extract_strided_slice %4 {offsets = [6, 0], sizes = [9, 8], strides = [1, 1]} : vector<15x8xbf16> to vector<9x8xbf16>
    %12 = tpu.concatenate %5, %6, %7, %8, %9, %10, %11 in 1 : vector<9x8xbf16>, vector<9x8xbf16>, vector<9x8xbf16>, vector<9x8xbf16>, vector<9x8xbf16>, vector<9x8xbf16>, vector<9x8xbf16> -> vector<9x56xbf16>
    %c0_2 = arith.constant 0 : index
    %c0_3 = arith.constant 0 : index
    %13 = vector.load %arg2[%c0_2, %c0_3] : memref<56x32xbf16, #tpu.memory_space<vmem>>, vector<56x32xbf16>
    %cst_4 = arith.constant dense<0.000000e+00> : vector<9x32xf32>
    %14 = tpu.matmul %12, %13, %cst_4 {dimension_numbers = #tpu.dot_dimension_numbers<[1], [0], [0], [1], [0, 0, 1, 1], [], []>} : vector<9x56xbf16>, vector<56x32xbf16>, vector<9x32xf32> -> vector<9x32xf32>
    %c0_5 = arith.constant 0 : index
    %c0_6 = arith.constant 0 : index
    %15 = vector.load %arg3[%c0_5, %c0_6] : memref<1x32xf32, #tpu.memory_space<vmem>>, vector<1x32xf32>
    %16 = vector.shape_cast %15 : vector<1x32xf32> to vector<32xf32>
    %17 = vector.shape_cast %16 : vector<32xf32> to vector<1x32xf32>
    %18 = vector.broadcast %17 : vector<1x32xf32> to vector<9x32xf32>
    %19 = arith.addf %14, %18 : vector<9x32xf32>
    %c0_7 = arith.constant 0 : index
    %c0_8 = arith.constant 0 : index
    %20 = vector.load %arg4[%c0_7, %c0_8] : memref<1x32xf32, #tpu.memory_space<vmem>>, vector<1x32xf32>
    %21 = vector.shape_cast %20 : vector<1x32xf32> to vector<32xf32>
    %c0_9 = arith.constant 0 : index
    %c0_10 = arith.constant 0 : index
    %22 = vector.load %arg5[%c0_9, %c0_10] : memref<1x32xf32, #tpu.memory_space<vmem>>, vector<1x32xf32>
    %23 = vector.shape_cast %22 : vector<1x32xf32> to vector<32xf32>
    %cst_11 = arith.constant dense<0.000000e+00> : vector<9xf32>
    %24 = vector.multi_reduction <add>, %19, %cst_11 [1] : vector<9x32xf32> to vector<9xf32>
    %25 = vector.shape_cast %24 : vector<9xf32> to vector<9x1xf32>
    %cst_12 = arith.constant 3.200000e+01 : f32
    %26 = vector.broadcast %cst_12 : f32 to vector<9x1xf32>
    %27 = arith.divf %25, %26 : vector<9x1xf32>
    %28 = vector.broadcast %27 : vector<9x1xf32> to vector<9x32xf32>
    %29 = arith.subf %19, %28 : vector<9x32xf32>
    %30 = arith.mulf %29, %29 : vector<9x32xf32>
    %cst_13 = arith.constant dense<0.000000e+00> : vector<9xf32>
    %31 = vector.multi_reduction <add>, %30, %cst_13 [1] : vector<9x32xf32> to vector<9xf32>
    %32 = vector.shape_cast %31 : vector<9xf32> to vector<9x1xf32>
    %cst_14 = arith.constant 3.200000e+01 : f32
    %33 = vector.broadcast %cst_14 : f32 to vector<9x1xf32>
    %34 = arith.divf %32, %33 : vector<9x1xf32>
    %cst_15 = arith.constant 9.99999974E-6 : f32
    %35 = vector.broadcast %cst_15 : f32 to vector<9x1xf32>
    %36 = arith.addf %34, %35 : vector<9x1xf32>
    %37 = math.rsqrt %36 : vector<9x1xf32>
    %38 = vector.broadcast %37 : vector<9x1xf32> to vector<9x32xf32>
    %39 = arith.mulf %29, %38 : vector<9x32xf32>
    %40 = vector.shape_cast %21 : vector<32xf32> to vector<1x32xf32>
    %41 = vector.broadcast %40 : vector<1x32xf32> to vector<9x32xf32>
    %42 = arith.mulf %39, %41 : vector<9x32xf32>
    %43 = vector.shape_cast %23 : vector<32xf32> to vector<1x32xf32>
    %44 = vector.broadcast %43 : vector<1x32xf32> to vector<9x32xf32>
    %45 = arith.addf %42, %44 : vector<9x32xf32>
    %c0_16 = arith.constant 0 : index
    %c0_17 = arith.constant 0 : index
    %c0_18 = arith.constant 0 : index
    %46 = vector.load %arg6[%c0_16, %c0_17, %c0_18] : memref<1x9x32xf32, #tpu.memory_space<vmem>>, vector<1x9x32xf32>
    %47 = vector.shape_cast %46 : vector<1x9x32xf32> to vector<9x32xf32>
    %48 = vector.shape_cast %45 : vector<9x32xf32> to vector<1x9x32xf32>
    tpu.vector_store %arg6[%c0_16, %c0_17, %c0_18], %48 {strides = array<i32>} : memref<1x9x32xf32, #tpu.memory_space<vmem>>, vector<1x9x32xf32>,
    return
  }
  func.func @transform_0(%arg0: i32) -> (i32, i32, i32) {
    %c0_i32 = arith.constant 0 : i32
    %c0_i32_0 = arith.constant 0 : i32
    %c0_i32_1 = arith.constant 0 : i32
    return %arg0, %c0_i32, %c0_i32_0 : i32, i32, i32
  }
  func.func @transform_1(%arg0: i32) -> (i32, i32) {
    %c0_i32 = arith.constant 0 : i32
    %c0_i32_0 = arith.constant 0 : i32
    %c0_i32_1 = arith.constant 0 : i32
    return %c0_i32, %c0_i32_0 : i32, i32
  }
  func.func @transform_2(%arg0: i32) -> (i32, i32) {
    %c0_i32 = arith.constant 0 : i32
    %c0_i32_0 = arith.constant 0 : i32
    %c0_i32_1 = arith.constant 0 : i32
    return %c0_i32, %c0_i32_0 : i32, i32
  }
  func.func @transform_3(%arg0: i32) -> (i32, i32) {
    %c0_i32 = arith.constant 0 : i32
    %c0_i32_0 = arith.constant 0 : i32
    %c0_i32_1 = arith.constant 0 : i32
    return %c0_i32, %c0_i32_0 : i32, i32
  }
  func.func @transform_4(%arg0: i32) -> (i32, i32) {
    %c0_i32 = arith.constant 0 : i32
    %c0_i32_0 = arith.constant 0 : i32
    %c0_i32_1 = arith.constant 0 : i32
    return %c0_i32, %c0_i32_0 : i32, i32
  }
  func.func @transform_5(%arg0: i32) -> (i32, i32, i32) {
    %c0_i32 = arith.constant 0 : i32
    %c0_i32_0 = arith.constant 0 : i32
    %c0_i32_1 = arith.constant 0 : i32
    return %arg0, %c0_i32, %c0_i32_0 : i32, i32, i32
  }
}

</mosaic_0001>

<bundles_post_ra>
// kernel: tpu_custom_call.1
= control target key start
LH: loop header
LB: loop body
LE: loop exit
PB: predicated region body
PF: predicated region fallthrough
CT: control target
= control target key end

     0   :  { %s586_s18 = smov 0   ;;  %s638_s0 = inlined_call_operand.vmem [shape: f32[2,9,8], index: 0, kind: input, shape index: {}]   ;;  %s639_s1 = inlined_call_operand.vmem [shape: bf16[56,32], index: 1, kind: input, shape index: {}]   ;;  %s640_s2 = inlined_call_operand.vmem [shape: f32[1,32], index: 2, kind: input, shape index: {}]   ;;  %s641_s3 = inlined_call_operand.vmem [shape: f32[1,32], index: 3, kind: input, shape index: {}]   ;;  %s642_s4 = inlined_call_operand.vmem [shape: f32[1,32], index: 4, kind: input, shape index: {}]   ;;  %s643_s5 = inlined_call_operand.vmem [shape: f32[2,9,32], index: 5, kind: output, shape index: {}]  }
   0x1 LB: > { %s478_s19 = sadd.s32 4294967295, %s546_s18   ;;  %p482_p0 = scmp.ge.s32.totalorder %s546_s18, 1  ;;  %s546_s18 = sphi %s586_s18, %s15_s18  }
   0x2   : > { %p187_p1 = scmp.lt.s32.totalorder %s546_s18, 3 }
   0x4   : > { %p188_p2 = pnand %p482_p0, %p187_p1 }
   0x5   : > { %p215_p3 = scmp.lt.s32.totalorder (!%p188_p2), %s478_s19, 1  ;;  %s550_s7 = smov (!%p188_p2), 16  }
   0x6   : > { %191 = sbr.rel (%p188_p2) target bundleno = 660 (0x294), region = 40  ;;  %s551_s8 = smov (!%p188_p2), 32  }
   0x7   : > { %s552_s9 = smov (!%p188_p2), 8   ;;  %s553_s10 = smov (!%p188_p2), 24  }
   0x8   : > { %s554_s11 = smov (!%p188_p2), 40   ;;  %s555_s12 = smov (!%p188_p2), 48  }
   0xb   : > { %vm330_vm0 = vcmask 1043456   ;;  %s645_s19 = smov (!%p215_p3, %s478_s19), 1  ;;  %v548_v0 = vmov 0.0   ;;  %v532_v1 = vld [vmem:[%s639_s1 + $0x18] ss:$0 sps:$4 sm:$0xff]   ;;  %v533_v3 = vld [vmem:[%s639_s1 + $0x10] sm:$0xff]  }
   0xc   : > { %504 = vmatprep.subr.bf16.mxu0 %v548_v0  ;;  %s497_s22 = sshll.u32 %s645_s19, 4  ;;  %v332_v2 = vsel %vm330_vm0, %v532_v1, 0  ;;  %vm238_vm1 = vcmask 1041408   ;;  %vm239_vm2 = vsmask.f32 1280  ;;  %v534_v9 = vld [vmem:[%s639_s1 + $0x8] sm:$0xff]  }
   0xd   : > { %s219_s25 = scalar_lea.vmem %s638_s0, %s497_s22  ;;  %505 = vmatpush3.bf16.msra.mxu0 %v332_v2  ;;  %vm240_vm3 = vmand %vm238_vm1, %vm239_vm2  ;;  %vm242_vm4 = vcmask 1045504   ;;  %v535_v13 = vld [vmem:[%s639_s1] sm:$0xff]   ;;  %vm549_vm5 = vmmov 0   ;;  %vm274_vm6 = vcmask 64512   ;;  %vm277_vm7 = vcmask 130048   ;;  %s224_s24 = scalar_lea.vmem %s643_s5, %s497_s22 }
   0xe   : > { %v226_v4 = vld [vmem:[%s219_s25] sm:$0xff]  ;;  %v227_v5 = vld [vmem:[%s219_s25 + $0x8] sm:$0x1]  ;;  %506 = vmatprep.subr.bf16.mxu0 %v548_v0  ;;  %512 = vmatprep.mubr.msk.bf16.mxu0 %vm549_vm5, %v548_v0  ;;  %vm280_vm8 = vcmask 195584   ;;  %vm283_vm9 = vcmask 261120   ;;  %vm286_vm10 = vcmask 326656  }
   0xf   : > { %v228_v6 = vpack.c.bf16 %v227_v5, %v226_v4  ;;  %vm289_vm11 = vcmask 392192   ;;  %vm327_vm12 = vcmask 457728   ;;  %v487_v41 = vld [vmem:[%s640_s2] ss:$0 sm:$0xff]  ;;  %vm380_vm13 = vcmask 253952  }
  0x10   : > { %v494_v5 = vld [vmem:[%s642_s4] ss:$0 sm:$0xff] }
  0x11   : > { %v230_v7 = vshrl.u32 %v228_v6, 16  ;;  %v233_v8 = vshll.u32 %v228_v6, 16  ;;  %507 = vmatpush3.bf16.msra.mxu0 %v533_v3  ;;  %v493_v3 = vld [vmem:[%s641_s3] ss:$0 sm:$0xff] }
  0x12   : > { %508 = vmatprep.subr.bf16.mxu0 %v548_v0 }
  0x13   : > { %v232_v10 = vrot.slane %v230_v7, 6  ;;  %v235_v11 = vrot.slane %v233_v8, 7 }
  0x15   : > { %v236_v12 = vor.u32 %v235_v11, %v232_v10  ;;  %509 = vmatpush3.bf16.msra.mxu0 %v534_v9 }
  0x16   : > { %510 = vmatprep.subr.bf16.mxu0 %v548_v0 }
  0x17   : > { %v241_v14 = vsel %vm240_vm3, 0, %v236_v12 }
  0x18   : > { %v245_v15 = vsel %vm242_vm4, %v241_v14, 0 }
  0x19   : > { %v255_v16 = vrot.slane %v245_v15, 1  ;;  %v263_v17 = vrot.slane %v245_v15, 2  ;;  %v246_v18 = vshrl.u32 %v245_v15, 16  ;;  %v248_v19 = vshll.u32 %v245_v15, 16  ;;  %511 = vmatpush3.bf16.msra.mxu0 %v535_v13 }
  0x1a   : > { %v271_v28 = vrot.slane %v245_v15, 3 }
  0x1b   : > { %256 = vrot.lane.b32.xlu0 %v255_v16, %s550_s7  ;;  %264 = vrot.lane.b32.xlu1 %v263_v17, %s551_s8  ;;  %v250_v20 = vrot.slane %v248_v19, 1  ;;  %v258_v21 = vrot.slane %v246_v18, 1  ;;  %v259_v22 = vrot.slane %v248_v19, 2  ;;  %v266_v23 = vrot.slane %v246_v18, 2 }
  0x1c   : > { %v267_v24 = vrot.slane %v248_v19, 3 }
  0x1d   : > { %v251_v25 = vor.u32 %v250_v20, %v246_v18  ;;  %v260_v26 = vor.u32 %v259_v22, %v258_v21 }
  0x1e   : > { %v268_v27 = vor.u32 %v267_v24, %v266_v23 }
  0x1f   : > { %252 = vrot.lane.b32.xlu0 %v251_v25, %s552_s9  ;;  %261 = vrot.lane.b32.xlu1 %v260_v26, %s553_s10 }
  0x23   : > { %269 = vrot.lane.b32.xlu0 %v268_v27, %s554_s11  ;;  %272 = vrot.lane.b32.xlu1 %v271_v28, %s555_s12 }
  0x8d   : > { %v257_v29 = vpop.permute.xlu0 %256  ;;  %v265_v30 = vpop.permute.xlu1 %264 }
  0x91   : > { %v253_v31 = vpop.permute.xlu0 %252  ;;  %v262_v32 = vpop.permute.xlu1 %261 }
  0x92   : > { %v276_v33 = vsel %vm274_vm6, %v245_v15, %v253_v31 }
  0x93   : > { %v279_v34 = vsel %vm277_vm7, %v276_v33, %v257_v29 }
  0x94   : > { %v282_v35 = vsel %vm280_vm8, %v279_v34, %v262_v32 }
  0x95   : > { %v285_v36 = vsel %vm283_vm9, %v282_v35, %v265_v30  ;;  %v270_v37 = vpop.permute.xlu0 %269  ;;  %v273_v38 = vpop.permute.xlu1 %272 }
  0x96   : > { %v288_v39 = vsel %vm286_vm10, %v285_v36, %v270_v37 }
  0x97   : > { %v291_v40 = vsel %vm289_vm11, %v288_v39, %v273_v38 }
  0x98   : > { %513 = vmatmul.mubr.msk.bf16.vlgmr.msra.gmra.mxu0 %vm327_vm12, %v291_v40 }
 0x158   : > { %v368_v42 = vpop.f32.mrf.mxu0 }
 0x159   : > { %v369_v43 = vadd.f32 %v487_v41, %v368_v42 }
 0x15a   : > { %v514_v44 = vpop.f32.mrf.mxu0 }
 0x15b   : > { %v377_v45 = vsel %vm283_vm9, %v369_v43, 0.0 }
 0x15c   : > { %378 = vadd.xlane.f32.xlu0 %v377_v45  ;;  %v371_v46 = vpop.f32.mrf.mxu0 }
 0x15d   : > { %v372_v47 = vadd.f32 %v487_v41, %v371_v46 }
 0x15e   : > { %v515_v48 = vpop.f32.mrf.mxu0 }
 0x15f   : > { %v381_v49 = vsel %vm380_vm13, %v372_v47, 0.0 }
 0x160   : > { %382 = vadd.xlane.f32.xlu1 %v381_v49 }
 0x1e5   : > { %v379_v50 = vpop.xlane.xlu0 %378 }
 0x1e6   : > { %v385_v51 = vmul.f32 0.03125, %v379_v50 }
 0x1e8   : > { %v387_v52 = vsub.f32 %v369_v43, %v385_v51 }
 0x1e9   : > { %v383_v53 = vpop.xlane.xlu1 %382 }
 0x1ea   : > { %v386_v54 = vmul.f32 0.03125, %v383_v53  ;;  %v389_v55 = vmul.f32 %v387_v52, %v387_v52 }
 0x1ec   : > { %v388_v56 = vsub.f32 %v372_v47, %v386_v54  ;;  %v391_v57 = vsel %vm283_vm9, %v389_v55, 0.0 }
 0x1ed   : > { %392 = vadd.xlane.f32.xlu0 %v391_v57 }
 0x1ee   : > { %v390_v58 = vmul.f32 %v388_v56, %v388_v56 }
 0x1f0   : > { %v394_v59 = vsel %vm380_vm13, %v390_v58, 0.0 }
 0x1f1   : > { %395 = vadd.xlane.f32.xlu0 %v394_v59 }
 0x276   : > { %v393_v60 = vpop.xlane.xlu0 %392 }
 0x277   : > { %v397_v61 = vmul.f32 0.03125, %v393_v60 }
 0x279   : > { %v399_v62 = vadd.f32 1e-05, %v397_v61 }
 0x27a   : > { %v396_v63 = vpop.xlane.xlu0 %395 }
 0x27b   : > { %536 = vrsqrt.f32 %v399_v62  ;;  %v398_v0 = vmul.f32 0.03125, %v396_v63 }
 0x27d   : > { %v400_v1 = vadd.f32 1e-05, %v398_v0 }
 0x27f   : > { %538 = vrsqrt.f32 %v400_v1 }
 0x288   : > { %v537_v2 = vpop.eup %536 }
 0x289   : > { %v403_v4 = vmul.f32 %v537_v2, %v387_v52 }
 0x28b   : > { %v411_v6 = vmul.f32 %v493_v3, %v403_v4 }
 0x28c   : > { %v539_v7 = vpop.eup %538 }
 0x28d   : > { %v419_v8 = vadd.f32 %v494_v5, %v411_v6  ;;  %v404_v9 = vmul.f32 %v539_v7, %v388_v56 }
 0x28f   : > { %421 = vst.msk [vmem:[%s224_s24] sm:$0xff] %vm283_vm9, %v419_v8  ;;  %v412_v10 = vmul.f32 %v493_v3, %v404_v9 }
 0x291   : > { %v420_v11 = vadd.f32 %v494_v5, %v412_v10 }
 0x293   : > { %422 = vst.msk [vmem:[%s224_s24 + $0x8] sm:$0x1] %vm380_vm13, %v420_v11 }
 0x294 PF: > { %s15_s18 = sadd.s32 1, %s546_s18  }
 0x295   : > { %p12_p4 = scmp.ge.s32.totalorder %s15_s18, 4  }
 0x297   :  { %14 = sbr.rel (!%p12_p4) target bundleno = 1 (0x1), region = 70 }

</bundles_post_ra>
